<compile_context>
chip_gen: v7x
topology: tpu7x:2x2x1
jax: 0.10.0
libtpu: 0.0.40
codegen_flags: <defaults>
</compile_context>

<pallas_src>
import math

import jax
import jax.numpy as jnp
from jax.experimental import pallas as pl
from jax.experimental.pallas import tpu as pltpu


def _round_up(x, m):
    return ((x + m - 1) // m) * m


def _pick_tile(dim, candidates):
    for c in candidates:
        if dim % c == 0:
            return c
    return dim


def _vmem_budget_bytes():
    """Generation-aware VMEM budget (~80% of physical capacity).

    ~102 MiB on v5e/v6e (128 MiB VMEM), ~51 MiB on v7x (64 MiB per TC): leaves
    headroom for Mosaic's own scratch."""
    try:
        cap = int(pltpu.get_tpu_info().vmem_capacity_bytes)
    except Exception:
        cap = 64 * 1024 * 1024
    return max(16 * 1024 * 1024, int(cap * 0.8))


# ---------------------------------------------------------------------------
# Kernels
# ---------------------------------------------------------------------------
def _head_kernel_fused(cls_ref, wp_ref, bp_ref, wc_ref, bc_ref, out_ref):
    # cls_ref: (bt, Hp) bf16   wp_ref: (Hp, Hp) bf16 (resident, DMA'd once)
    # bp_ref:  (1, Hp) f32     wc_ref: (Hp, Lp) bf16 (resident)   bc_ref: (1, Lp) f32
    # out_ref: (bt, Lp) f32
    pooled = jnp.tanh(
        jnp.dot(cls_ref[...], wp_ref[...], preferred_element_type=jnp.float32)
        + bp_ref[...])
    logits = jnp.dot(pooled.astype(wc_ref.dtype), wc_ref[...],
                     preferred_element_type=jnp.float32) + bc_ref[...]
    out_ref[...] = logits.astype(out_ref.dtype)


def _head_kernel_ktiled(cls_ref, wp_ref, bp_ref, wc_ref, bc_ref, out_ref, acc_ref):
    # Fallback for very large H: pooler contraction streamed over K tiles.
    k = pl.program_id(1)
    part = jnp.dot(cls_ref[...], wp_ref[...], preferred_element_type=jnp.float32)

    @pl.when(k == 0)
    def _():
        acc_ref[...] = part            # write, not zero-then-accumulate

    @pl.when(k > 0)
    def _():
        acc_ref[...] += part

    @pl.when(k == pl.num_programs(1) - 1)
    def _():
        pooled = jnp.tanh(acc_ref[...] + bp_ref[...])
        logits = jnp.dot(pooled.astype(wc_ref.dtype), wc_ref[...],
                         preferred_element_type=jnp.float32) + bc_ref[...]
        out_ref[...] = logits.astype(out_ref.dtype)


# ---------------------------------------------------------------------------
# Parameter prep (run ONCE, hoisted out of the forward pass)
# ---------------------------------------------------------------------------
def prepare_lm_head_params(w_pool, b_pool, w_cls, b_cls):
    """Pad to TPU-friendly shapes and cast weights to bf16 once.

    w_pool: (H, H) stored in->out, b_pool: (H,)
    w_cls:  (H, L) stored in->out, b_cls:  (L,)"""
    H = w_pool.shape[0]
    L = w_cls.shape[1]
    H_pad = _round_up(H, 128)
    L_pad = _round_up(L, 128)        # lane-dense output store (no vst.msk)

    wp = jnp.pad(w_pool, ((0, H_pad - H), (0, H_pad - H))).astype(jnp.bfloat16)
    bp = jnp.pad(b_pool, (0, H_pad - H)).reshape(1, H_pad).astype(jnp.float32)
    wc = jnp.pad(w_cls, ((0, H_pad - H), (0, L_pad - L))).astype(jnp.bfloat16)
    bc = jnp.pad(b_cls, (0, L_pad - L)).reshape(1, L_pad).astype(jnp.float32)
    return dict(wp=wp, bp=bp, wc=wc, bc=bc, H=H, L=L, H_pad=H_pad, L_pad=L_pad)


# ---------------------------------------------------------------------------
# Forward wrapper
# ---------------------------------------------------------------------------
def lm_base_head(last_hidden_state, params, *, force_ktiled=False):
    """last_hidden_state: (B, S, H) f32; returns logits (B, L) f32."""
    B, S, H = last_hidden_state.shape
    assert H == params["H"]
    H_pad, L_pad, L = params["H_pad"], params["L_pad"], params["L"]

    # CLS slice only (never DMA the (B,S,H) tensor into VMEM); fused cast + pad of
    # the tiny (B, H) activation — weight pad/cast is done once in prepare_*.
    B_pad = _round_up(B, 16)                       # bf16 vreg packs 16 sublanes
    cls = last_hidden_state[:, 0, :].astype(jnp.bfloat16)
    cls_p = jnp.pad(cls, ((0, B_pad - B), (0, H_pad - H)))

    # Batch tile (parallel axis, megacore shardable).
    bt = _pick_tile(B_pad, (256, 128, 64, 32, 16))
    if B_pad >= 32 and B_pad // bt < 2:
        bt //= 2                                   # keep >=2 tiles for v7x's 2 TCs

    budget = _vmem_budget_bytes()

    # VMEM needed by the fused (K-collapsed) path: resident weights + double-
    # buffered activation / output blocks (weights conservatively counted 2x).
    fused_vmem = (2 * bt * H_pad * 2               # cls blocks (bf16)
                  + 2 * H_pad * H_pad * 2          # pooler weight (bf16)
                  + 2 * H_pad * 4                  # pooler bias (f32)
                  + 2 * H_pad * L_pad * 2          # classifier weight (bf16)
                  + 2 * L_pad * 4                  # classifier bias (f32)
                  + 2 * bt * L_pad * 4)            # output blocks (f32)
    use_fused = (not force_ktiled) and fused_vmem <= budget

    cost = pl.CostEstimate(
        flops=2 * B_pad * H_pad * H_pad + 2 * B_pad * H_pad * L_pad,
        transcendentals=B_pad * H_pad,
        bytes_accessed=(B_pad * H_pad * 2 + H_pad * H_pad * 2 + H_pad * 4
                        + H_pad * L_pad * 2 + L_pad * 4 + B_pad * L_pad * 4),
    )

    if use_fused:
        out_pad = pl.pallas_call(
            _head_kernel_fused,
            out_shape=jax.ShapeDtypeStruct((B_pad, L_pad), jnp.float32),
            grid_spec=pltpu.PrefetchScalarGridSpec(
                num_scalar_prefetch=0,
                grid=(B_pad // bt,),
                in_specs=[
                    pl.BlockSpec((bt, H_pad), lambda b: (b, 0)),        # cls
                    pl.BlockSpec((H_pad, H_pad), lambda b: (0, 0)),     # W_pool (resident)
                    pl.BlockSpec((1, H_pad), lambda b: (0, 0)),         # b_pool
                    pl.BlockSpec((H_pad, L_pad), lambda b: (0, 0)),     # W_cls (resident)
                    pl.BlockSpec((1, L_pad), lambda b: (0, 0)),         # b_cls
                ],
                out_specs=pl.BlockSpec((bt, L_pad), lambda b: (b, 0)),
            ),
            compiler_params=pltpu.CompilerParams(
                dimension_semantics=("parallel",),
                vmem_limit_bytes=budget,
            ),
            cost_estimate=cost,
        )(cls_p, params["wp"], params["bp"], params["wc"], params["bc"])
    else:
        # K-tiled fallback (very large H / tight VMEM, e.g. H >= ~4096 on v7x).
        if force_ktiled:
            tk = 128
        else:
            tk = 128
            for cand in (1024, 512, 256):
                if H_pad % cand == 0:
                    kt_vmem = (2 * bt * cand * 2 + 2 * cand * H_pad * 2
                               + 2 * H_pad * 4 + 2 * H_pad * L_pad * 2
                               + 2 * L_pad * 4 + 2 * bt * L_pad * 4
                               + bt * H_pad * 4)
                    if kt_vmem <= budget:
                        tk = cand
                        break
        out_pad = pl.pallas_call(
            _head_kernel_ktiled,
            out_shape=jax.ShapeDtypeStruct((B_pad, L_pad), jnp.float32),
            grid_spec=pltpu.PrefetchScalarGridSpec(
                num_scalar_prefetch=0,
                grid=(B_pad // bt, H_pad // tk),
                in_specs=[
                    pl.BlockSpec((bt, tk), lambda b, k: (b, k)),        # cls
                    pl.BlockSpec((tk, H_pad), lambda b, k: (k, 0)),     # W_pool (streamed)
                    pl.BlockSpec((1, H_pad), lambda b, k: (0, 0)),      # b_pool
                    pl.BlockSpec((H_pad, L_pad), lambda b, k: (0, 0)),  # W_cls
                    pl.BlockSpec((1, L_pad), lambda b, k: (0, 0)),      # b_cls
                ],
                out_specs=pl.BlockSpec((bt, L_pad), lambda b, k: (b, 0)),
                scratch_shapes=[pltpu.VMEM((bt, H_pad), jnp.float32)],
            ),
            compiler_params=pltpu.CompilerParams(
                dimension_semantics=("parallel", "arbitrary"),
                vmem_limit_bytes=budget,
            ),
            cost_estimate=cost,
        )(cls_p, params["wp"], params["bp"], params["wc"], params["bc"])

    return out_pad[:B, :L]


def _xavier_normal(key, out_features, in_features):
    # torch.nn.init.xavier_normal_ on a weight of shape (out, in)
    std = math.sqrt(2.0 / (in_features + out_features))
    return jax.random.normal(key, (out_features, in_features), dtype=jnp.float32) * std


if __name__ == "__main__":
    # Small shapes consistent with the forward.
    B, S, H, NUM_LABEL = 2, 8, 32, 2

    key = jax.random.PRNGKey(0)
    k_hs, k_pool, k_cls = jax.random.split(key, 3)

    # Synthetic backbone output (last_hidden_state).
    last_hidden_state = jax.random.normal(k_hs, (B, S, H), dtype=jnp.float32)

    # Pooler: nn.Linear(H, H), xavier_normal_ weight, zero bias (stored in->out).
    w_pool = _xavier_normal(k_pool, H, H).T
    b_pool = jnp.zeros((H,), dtype=jnp.float32)

    # Classifier: nn.Linear(H, NUM_LABEL), xavier_normal_ weight, zero bias.
    w_cls = _xavier_normal(k_cls, NUM_LABEL, H).T
    b_cls = jnp.zeros((NUM_LABEL,), dtype=jnp.float32)

    # One-time parameter prep (pad + bf16 cast hoisted out of the forward pass).
    params = prepare_lm_head_params(w_pool, b_pool, w_cls, b_cls)

    out = lm_base_head(last_hidden_state, params)
    out = jax.block_until_ready(out)

    # Pure-JAX f32 reference (kernel uses bf16 MXU operands -> bf16-level tolerance).
    cls_repr = last_hidden_state[:, 0, :]
    ref = jnp.tanh(cls_repr @ w_pool + b_pool) @ w_cls + b_cls

    assert out.shape == (B, NUM_LABEL)
    assert jnp.allclose(out, ref, atol=5e-2, rtol=5e-2), (out, ref)

    # Also exercise the K-tiled fallback path (used only for very large H).
    out_kt = jax.block_until_ready(
        lm_base_head(last_hidden_state, params, force_ktiled=True))
    assert jnp.allclose(out_kt, ref, atol=5e-2, rtol=5e-2), (out_kt, ref)

    print("KERNEL_OK")
</pallas_src>

<mosaic_0001>
module attributes {stable_mosaic.version = 11 : i64} {
  func.func @_head_kernel_fused(%arg0: i32, %arg1: memref<16x128xbf16, #tpu.memory_space<vmem>>, %arg2: memref<128x128xbf16, #tpu.memory_space<vmem>>, %arg3: memref<1x128xf32, #tpu.memory_space<vmem>>, %arg4: memref<128x128xbf16, #tpu.memory_space<vmem>>, %arg5: memref<1x128xf32, #tpu.memory_space<vmem>>, %arg6: memref<16x128xf32, #tpu.memory_space<vmem>>) attributes {dimension_semantics = [#tpu.dimension_semantics<parallel>], iteration_bounds = array<i64: 1>, scalar_prefetch = 0 : i64, scratch_operands = 0 : i64, tpu.core_type = #tpu.core_type<tc>, window_params = [{transform_indices = @transform_0, window_bounds = array<i64: 16, 128>}, {pipeline_mode = #tpu.pipeline_mode<synchronous>, transform_indices = @transform_1, window_bounds = array<i64: 128, 128>}, {pipeline_mode = #tpu.pipeline_mode<synchronous>, transform_indices = @transform_2, window_bounds = array<i64: 1, 128>}, {pipeline_mode = #tpu.pipeline_mode<synchronous>, transform_indices = @transform_3, window_bounds = array<i64: 128, 128>}, {pipeline_mode = #tpu.pipeline_mode<synchronous>, transform_indices = @transform_4, window_bounds = array<i64: 1, 128>}, {transform_indices = @transform_5, window_bounds = array<i64: 16, 128>}]} {
    %c0 = arith.constant 0 : index
    %c0_0 = arith.constant 0 : index
    %0 = vector.load %arg1[%c0, %c0_0] : memref<16x128xbf16, #tpu.memory_space<vmem>>, vector<16x128xbf16>
    %c0_1 = arith.constant 0 : index
    %c0_2 = arith.constant 0 : index
    %1 = vector.load %arg2[%c0_1, %c0_2] : memref<128x128xbf16, #tpu.memory_space<vmem>>, vector<128x128xbf16>
    %cst = arith.constant dense<0.000000e+00> : vector<16x128xf32>
    %2 = tpu.matmul %0, %1, %cst {dimension_numbers = #tpu.dot_dimension_numbers<[1], [0], [0], [1], [0, 0, 1, 1], [], []>} : vector<16x128xbf16>, vector<128x128xbf16>, vector<16x128xf32> -> vector<16x128xf32>
    %c0_3 = arith.constant 0 : index
    %c0_4 = arith.constant 0 : index
    %3 = vector.load %arg3[%c0_3, %c0_4] : memref<1x128xf32, #tpu.memory_space<vmem>>, vector<1x128xf32>
    %4 = vector.broadcast %3 : vector<1x128xf32> to vector<16x128xf32>
    %5 = arith.addf %2, %4 : vector<16x128xf32>
    %6 = math.tanh %5 : vector<16x128xf32>
    %7 = arith.truncf %6 : vector<16x128xf32> to vector<16x128xbf16>
    %c0_5 = arith.constant 0 : index
    %c0_6 = arith.constant 0 : index
    %8 = vector.load %arg4[%c0_5, %c0_6] : memref<128x128xbf16, #tpu.memory_space<vmem>>, vector<128x128xbf16>
    %cst_7 = arith.constant dense<0.000000e+00> : vector<16x128xf32>
    %9 = tpu.matmul %7, %8, %cst_7 {dimension_numbers = #tpu.dot_dimension_numbers<[1], [0], [0], [1], [0, 0, 1, 1], [], []>} : vector<16x128xbf16>, vector<128x128xbf16>, vector<16x128xf32> -> vector<16x128xf32>
    %c0_8 = arith.constant 0 : index
    %c0_9 = arith.constant 0 : index
    %10 = vector.load %arg5[%c0_8, %c0_9] : memref<1x128xf32, #tpu.memory_space<vmem>>, vector<1x128xf32>
    %11 = vector.broadcast %10 : vector<1x128xf32> to vector<16x128xf32>
    %12 = arith.addf %9, %11 : vector<16x128xf32>
    %c0_10 = arith.constant 0 : index
    %c0_11 = arith.constant 0 : index
    %13 = vector.load %arg6[%c0_10, %c0_11] : memref<16x128xf32, #tpu.memory_space<vmem>>, vector<16x128xf32>
    tpu.vector_store %arg6[%c0_10, %c0_11], %12 {strides = array<i32>} : memref<16x128xf32, #tpu.memory_space<vmem>>, vector<16x128xf32>,
    return
  }
  func.func @transform_0(%arg0: i32) -> (i32, i32) {
    %c0_i32 = arith.constant 0 : i32
    %c0_i32_0 = arith.constant 0 : i32
    return %arg0, %c0_i32 : i32, i32
  }
  func.func @transform_1(%arg0: i32) -> (i32, i32) {
    %c0_i32 = arith.constant 0 : i32
    %c0_i32_0 = arith.constant 0 : i32
    %c0_i32_1 = arith.constant 0 : i32
    return %c0_i32, %c0_i32_0 : i32, i32
  }
  func.func @transform_2(%arg0: i32) -> (i32, i32) {
    %c0_i32 = arith.constant 0 : i32
    %c0_i32_0 = arith.constant 0 : i32
    %c0_i32_1 = arith.constant 0 : i32
    return %c0_i32, %c0_i32_0 : i32, i32
  }
  func.func @transform_3(%arg0: i32) -> (i32, i32) {
    %c0_i32 = arith.constant 0 : i32
    %c0_i32_0 = arith.constant 0 : i32
    %c0_i32_1 = arith.constant 0 : i32
    return %c0_i32, %c0_i32_0 : i32, i32
  }
  func.func @transform_4(%arg0: i32) -> (i32, i32) {
    %c0_i32 = arith.constant 0 : i32
    %c0_i32_0 = arith.constant 0 : i32
    %c0_i32_1 = arith.constant 0 : i32
    return %c0_i32, %c0_i32_0 : i32, i32
  }
  func.func @transform_5(%arg0: i32) -> (i32, i32) {
    %c0_i32 = arith.constant 0 : i32
    %c0_i32_0 = arith.constant 0 : i32
    return %arg0, %c0_i32 : i32, i32
  }
}

</mosaic_0001>

<bundles_post_ra>
// kernel: tpu_custom_call.1
= control target key start
LH: loop header
LB: loop body
LE: loop exit
PB: predicated region body
PF: predicated region fallthrough
CT: control target
= control target key end

     0   :  { %10 = vsyncpa [#allocation3], 0  ;;  %s630_s0 = inlined_call_operand.hbm [shape: bf16[16,128], index: 0, kind: input, shape index: {}]   ;;  %s631_s1 = inlined_call_operand.hbm [shape: bf16[128,128], index: 1, kind: input, shape index: {}]   ;;  %s632_s2 = inlined_call_operand.vmem [shape: f32[1,128], index: 2, kind: input, shape index: {}]   ;;  %s633_s3 = inlined_call_operand.hbm [shape: bf16[128,128], index: 3, kind: input, shape index: {}]   ;;  %s634_s4 = inlined_call_operand.vmem [shape: f32[1,128], index: 4, kind: input, shape index: {}]   ;;  %s635_s5 = inlined_call_operand.hbm [shape: f32[16,128], index: 5, kind: output, shape index: {}]  }
   0x1   :  { %11 = vsyncpa [#allocation6], 0 }
   0x2   :  { %12 = vsyncpa [#allocation4], 0  ;;  %s520_s18 = smov [#allocation5]   ;;  %s521_s20 = smov [#allocation2]  }
   0x3   :  { %s30_s19 = sshll.u32 %s520_s18, 4  ;;  %s18_s21 = sshll.u32 %s521_s20, 4  ;;  %s31_s19 = int_to_ptr.vmem [resolvable:$true] %s30_s19  ;;  %s560_s21 = int_to_ptr.vmem [resolvable:$true] %s18_s21 }
   0x4   :  { %s426_s24 = scalar_lea.hbm %s631_s1, 1024 }
   0x5   :  { %p427_p0 = scmp.ne.s32.totalorder %s631_s1, %s426_s24  ;;  %p430_p1 = scmp.lt.u32.totalorder %s426_s24, %s631_s1 }
   0x7   :  { %p432_p2 = pnand %p430_p1, %p427_p0 }
   0x9   :  { %435 = shalt.err (!%p432_p2)
}
   0xa   :  { %s436_s29 = scalar_lea.vmem %s31_s19, 1024  ;;  %p441_p4 = scmp.lt.s32.totalorder %s31_s19, %s31_s19 }
   0xb   :  { %p437_p3 = scmp.ne.s32.totalorder %s31_s19, %s436_s29  ;;  %p442_p5 = scmp.lt.s32.totalorder %s436_s29, %s436_s29 }
   0xd   :  { %p443_p6 = por %p442_p5, %p441_p4 }
   0xf   :  { %p444_p7 = pnand %p443_p6, %p437_p3 }
  0x11   :  { %447 = shalt.err (!%p444_p7)
}
  0x12   :  { %s522_s30 = smov 64   ;;  %s523_s6 = smov 4  }
  0x13   :  { %36 = dma.hbm_to_vmem [thread:$0]  %s631_s1, 1024, %s31_s19, [#allocation6], %s522_s30, %s522_s30, %s523_s6  }
  0x14   :  { %s448_s11 = scalar_lea.hbm %s630_s0, 128 }
  0x15   :  { %p449_p8 = scmp.ne.s32.totalorder %s630_s0, %s448_s11  ;;  %p452_p9 = scmp.lt.u32.totalorder %s448_s11, %s630_s0 }
  0x17   :  { %p454_p10 = pnand %p452_p9, %p449_p8 }
  0x19   :  { %457 = shalt.err (!%p454_p10)
}
  0x1a   :  { %s458_s16 = scalar_lea.vmem %s560_s21, 128  ;;  %p463_p12 = scmp.lt.s32.totalorder %s560_s21, %s560_s21 }
  0x1b   :  { %p459_p11 = scmp.ne.s32.totalorder %s560_s21, %s458_s16  ;;  %p464_p13 = scmp.lt.s32.totalorder %s458_s16, %s458_s16 }
  0x1d   :  { %p465_p0 = por %p464_p13, %p463_p12 }
  0x1f   :  { %p466_p1 = pnand %p465_p0, %p459_p11 }
  0x21   :  { %469 = shalt.err (!%p466_p1)
}
  0x22   :  { %24 = dma.hbm_to_vmem [thread:$0]  %s630_s0, 128, %s560_s21, [#allocation3], %s522_s30, %s522_s30, %s523_s6  }
  0x23   :  { %s524_s18 = smov [#allocation7]   ;;  %s470_s23 = scalar_lea.hbm %s633_s3, 1024 }
  0x24   :  { %s44_s19 = sshll.u32 %s524_s18, 4  ;;  %p471_p2 = scmp.ne.s32.totalorder %s633_s3, %s470_s23  ;;  %s45_s19 = int_to_ptr.vmem [resolvable:$true] %s44_s19 }
  0x25   :  { %p474_p3 = scmp.lt.u32.totalorder %s470_s23, %s633_s3 }
  0x27   :  { %p476_p4 = pnand %p474_p3, %p471_p2 }
  0x29   :  { %479 = shalt.err (!%p476_p4)
}
  0x2a   :  { %s480_s28 = scalar_lea.vmem %s45_s19, 1024  ;;  %p485_p6 = scmp.lt.s32.totalorder %s45_s19, %s45_s19 }
  0x2b   :  { %p481_p5 = scmp.ne.s32.totalorder %s45_s19, %s480_s28  ;;  %p486_p7 = scmp.lt.s32.totalorder %s480_s28, %s480_s28 }
  0x2d   :  { %p487_p8 = por %p486_p7, %p485_p6 }
  0x2f   :  { %p488_p9 = pnand %p487_p8, %p481_p5 }
  0x31   :  { %491 = shalt.err (!%p488_p9)
}
  0x32   :  { %50 = dma.hbm_to_vmem [thread:$0]  %s633_s3, 1024, %s45_s19, [#allocation6], %s522_s30, %s522_s30, %s523_s6  }
  0x33   :  { %514 = dma.done.wait [#allocation3], 128  }
  0x34   :  { %515 = vsyncadd [#allocation3], 4294967168 }
  0x35   :  { %516 = dma.done.wait [#allocation6], 2048  }
  0x36   :  { %517 = vsyncadd [#allocation6], 4294965248  ;;  %v525_v0 = vmov 0.0   ;;  %vm526_vm0 = vmmov 0   ;;  %v405_v1 = vld [vmem:[#allocation5] sm:$0xff]   ;;  %v406_v2 = vld [vmem:[#allocation5 + $0x8] sm:$0xff]  }
  0x37   :  { %355 = vmatprep.subr.bf16.mxu0 %v525_v0  ;;  %371 = vmatprep.mubr.msk.bf16.mxu0 %vm526_vm0, %v525_v0  ;;  %v407_v3 = vld [vmem:[#allocation5 + $0x10] sm:$0xff]   ;;  %v414_v4 = vld [vmem:[#allocation7] sm:$0xff]   ;;  %v408_v5 = vld [vmem:[#allocation5 + $0x18] sm:$0xff]   ;;  %s527_s7 = smov [#allocation8]  }
  0x38   :  { %375 = vmatprep.subr.bf16.mxu1 %v525_v0  ;;  %391 = vmatprep.mubr.msk.bf16.mxu1 %vm526_vm0, %v525_v0  ;;  %v415_v6 = vld [vmem:[#allocation7 + $0x8] sm:$0xff]   ;;  %v409_v7 = vld [vmem:[#allocation5 + $0x20] sm:$0xff]   ;;  %v416_v8 = vld [vmem:[#allocation7 + $0x10] sm:$0xff]   ;;  %s305_s8 = sshll.u32 %s527_s7, 4  ;;  %s306_s8 = int_to_ptr.vmem [resolvable:$true] %s305_s8 }
  0x39   :  { %356 = vmatpush3.bf16.msra.mxu0 %v405_v1  ;;  %376 = vmatpush3.bf16.msra.mxu1 %v414_v4  ;;  %v410_v9 = vld [vmem:[#allocation5 + $0x28] sm:$0xff]   ;;  %v417_v10 = vld [vmem:[#allocation7 + $0x18] sm:$0xff]   ;;  %v411_v11 = vld [vmem:[#allocation5 + $0x30] sm:$0xff]   ;;  %p497_p11 = scmp.lt.s32.totalorder %s306_s8, %s306_s8 }
  0x3a   :  { %357 = vmatprep.subr.bf16.mxu0 %v525_v0  ;;  %377 = vmatprep.subr.bf16.mxu1 %v525_v0  ;;  %v412_v12 = vld [vmem:[#allocation5 + $0x38] sm:$0xff]   ;;  %v418_v14 = vld [vmem:[#allocation7 + $0x20] sm:$0xff]   ;;  %v419_v15 = vld [vmem:[#allocation7 + $0x28] sm:$0xff]  }
  0x3b   :  { %v413_v13 = vld [vmem:[#allocation2] sm:$0xff]   ;;  %v420_v16 = vld [vmem:[#allocation7 + $0x30] sm:$0xff]  }
  0x3c   :  { %v421_v17 = vld [vmem:[#allocation7 + $0x38] sm:$0xff]  }
  0x3d   :  { %358 = vmatpush3.bf16.msra.mxu0 %v406_v2  ;;  %378 = vmatpush3.bf16.msra.mxu1 %v415_v6  ;;  %v318_v18 = vld [vmem:[%s632_s2] ss:$0 sm:$0xff]  ;;  %s492_s2 = scalar_lea.vmem %s306_s8, 256 }
  0x3e   :  { %359 = vmatprep.subr.bf16.mxu0 %v525_v0  ;;  %379 = vmatprep.subr.bf16.mxu1 %v525_v0  ;;  %v328_v28 = vld [vmem:[%s634_s4] ss:$0 sm:$0xff]  ;;  %p493_p10 = scmp.ne.s32.totalorder %s306_s8, %s492_s2  ;;  %p498_p12 = scmp.lt.s32.totalorder %s492_s2, %s492_s2 }
  0x40   :  { %p499_p13 = por %p498_p12, %p497_p11 }
  0x41   :  { %360 = vmatpush3.bf16.msra.mxu0 %v407_v3  ;;  %380 = vmatpush3.bf16.msra.mxu1 %v416_v8 }
  0x42   :  { %361 = vmatprep.subr.bf16.mxu0 %v525_v0  ;;  %381 = vmatprep.subr.bf16.mxu1 %v525_v0  ;;  %p500_p0 = pnand %p499_p13, %p493_p10 }
  0x45   :  { %362 = vmatpush3.bf16.msra.mxu0 %v408_v5  ;;  %382 = vmatpush3.bf16.msra.mxu1 %v417_v10 }
  0x46   :  { %363 = vmatprep.subr.bf16.mxu0 %v525_v0  ;;  %383 = vmatprep.subr.bf16.mxu1 %v525_v0 }
  0x49   :  { %364 = vmatpush3.bf16.msra.mxu0 %v409_v7  ;;  %384 = vmatpush3.bf16.msra.mxu1 %v418_v14 }
  0x4a   :  { %365 = vmatprep.subr.bf16.mxu0 %v525_v0  ;;  %385 = vmatprep.subr.bf16.mxu1 %v525_v0 }
  0x4d   :  { %366 = vmatpush3.bf16.msra.mxu0 %v410_v9  ;;  %386 = vmatpush3.bf16.msra.mxu1 %v419_v15 }
  0x4e   :  { %367 = vmatprep.subr.bf16.mxu0 %v525_v0  ;;  %387 = vmatprep.subr.bf16.mxu1 %v525_v0 }
  0x51   :  { %368 = vmatpush3.bf16.msra.mxu0 %v411_v11  ;;  %388 = vmatpush3.bf16.msra.mxu1 %v420_v16 }
  0x52   :  { %369 = vmatprep.subr.bf16.mxu0 %v525_v0  ;;  %389 = vmatprep.subr.bf16.mxu1 %v525_v0 }
  0x55   :  { %370 = vmatpush3.bf16.msra.mxu0 %v412_v12  ;;  %390 = vmatpush3.bf16.msra.mxu1 %v421_v17 }
  0x58   :  { %372 = vmatmul.mubr.bf16.vlgmr.msra.gmra.mrb[0].mxu0 %v413_v13 }
 0x12b   :  { %v176_v19 = vpop.f32.mrb[0].mxu0 }
 0x12c   :  { %v177_v20 = vadd.f32 %v318_v18, %v176_v19  ;;  %v373_v21 = vpop.f32.mrb[1].mxu0 }
 0x12d   :  { %v179_v22 = vpop.f32.mrb[2].mxu0 }
 0x12e   :  { %v180_v23 = vadd.f32 %v318_v18, %v179_v22  ;;  %v374_v24 = vpop.f32.mrb[3].mxu0  ;;  %422 = vtanh.f32 %v177_v20 }
 0x130   :  { %424 = vtanh.f32 %v180_v23 }
 0x138   :  { %v423_v25 = vpop.eup %422 }
 0x13a   :  { %v425_v26 = vpop.eup %424 }
 0x13b   :  { %v185_v27 = vpack.c.bf16 %v425_v26, %v423_v25 }
 0x13d   :  { %392 = vmatmul.mubr.bf16.vlgmr.msra.gmra.mrb[0].mxu1 %v185_v27 }
 0x210   :  { %v291_v29 = vpop.f32.mrb[0].mxu1 }
 0x211   :  { %v292_v30 = vadd.f32 %v328_v28, %v291_v29  ;;  %v393_v31 = vpop.f32.mrb[1].mxu1 }
 0x212   :  { %v294_v32 = vpop.f32.mrb[2].mxu1 }
 0x213   :  { %298 = vst [vmem:[#allocation8] sm:$0xff] %v292_v30  ;;  %v295_v33 = vadd.f32 %v328_v28, %v294_v32  ;;  %v394_v34 = vpop.f32.mrb[3].mxu1 }
 0x215   :  { %299 = vst [vmem:[#allocation8 + $0x8] sm:$0xff] %v295_v33 }
 0x216   :  { %503 = shalt.err (!%p500_p0)
}
 0x217   :  { %s504_s10 = scalar_lea.hbm %s635_s5, 256 }
 0x218   :  { %p505_p1 = scmp.ne.s32.totalorder %s635_s5, %s504_s10  ;;  %p508_p2 = scmp.lt.u32.totalorder %s504_s10, %s635_s5 }
 0x21a   :  { %p510_p3 = pnand %p508_p2, %p505_p1 }
 0x21c   :  { %513 = shalt.err (!%p510_p3)
}
 0x21d   :  { %s528_s15 = smov 128   ;;  %s529_s16 = smov 8  }
 0x21e   :  { %311 = dma.vmem_to_hbm [thread:$0]  %s306_s8, 256, %s635_s5, [#allocation4], %s528_s15, %s528_s15, %s529_s16  }
 0x21f   :  { %518 = dma.done.wait [#allocation4], 256  }
 0x220   :  { %519 = vsyncadd [#allocation4], 4294967040 }
 0x221   :  { %315 = vsyncpa [#allocation3], 1 }
 0x222   :  { %316 = vsyncpa [#allocation6], 1 }
 0x223   :  { %317 = vsyncpa [#allocation4], 1 }

</bundles_post_ra>
